<compile_context>
chip_gen: v7x
topology: tpu7x:2x2x1
jax: 0.10.0
libtpu: 0.0.40
codegen_flags: <defaults>
</compile_context>

<pallas_src>
import jax
import jax.numpy as jnp
from jax.experimental import pallas as pl
from jax.experimental.pallas import tpu as pltpu


# --------------------------------------------------------------------------
# Same-dtype path: chunked HBM -> HBM DMA (no VMEM round trip).
# --------------------------------------------------------------------------
def _make_hbm_copy_kernel(row_chunks):
    """row_chunks: static tuple of (start_row, n_rows)."""

    def kernel(x_hbm_ref, w_hbm_ref, o_hbm_ref, sems):
        del x_hbm_ref  # alias/donation target only -- never read (copy_ overwrites all).
        copies = []
        for j, (start, size) in enumerate(row_chunks):
            cp = pltpu.make_async_copy(
                w_hbm_ref.at[pl.ds(start, size)],
                o_hbm_ref.at[pl.ds(start, size)],
                sems.at[j],
            )
            cp.start()
            copies.append(cp)
        for cp in copies:
            cp.wait()

    return kernel


def _hbm_to_hbm_copy(x, weight_matrix, *, max_chunks=4):
    card, dim = weight_matrix.shape
    n_chunks = max(1, min(max_chunks, card))
    base, rem = divmod(card, n_chunks)
    row_chunks = []
    start = 0
    for i in range(n_chunks):
        size = base + (1 if i < rem else 0)
        if size > 0:
            row_chunks.append((start, size))
            start += size
    row_chunks = tuple(row_chunks)

    return pl.pallas_call(
        _make_hbm_copy_kernel(row_chunks),
        out_shape=jax.ShapeDtypeStruct((card, dim), x.dtype),
        in_specs=[
            pl.BlockSpec(memory_space=pl.ANY),  # x: alias target only, never DMA'd in
            pl.BlockSpec(memory_space=pl.ANY),  # weights: DMA source (stays in HBM)
        ],
        out_specs=pl.BlockSpec(memory_space=pl.ANY),
        scratch_shapes=[pltpu.SemaphoreType.DMA((len(row_chunks),))],
        # In-place semantics of torch's x.copy_(weight_matrix): x is the
        # donation/alias target and is overwritten.
        input_output_aliases={0: 0},
    )(x, weight_matrix)


# --------------------------------------------------------------------------
# Dtype-converting path: VMEM-pipelined copy with the cast fused in-kernel.
# --------------------------------------------------------------------------
def _cast_copy_kernel(x_hbm_ref, w_ref, o_ref):
    del x_hbm_ref  # alias/donation target only -- never read.
    o_ref[...] = w_ref[...].astype(o_ref.dtype)


def _vmem_capacity_bytes():
    """Device VMEM capacity; conservative v7x fallback if the query fails."""
    try:
        cap = int(pltpu.get_tpu_info().vmem_capacity_bytes)
        if cap > 0:
            return cap
    except Exception:
        pass
    return 64 << 20  # v7x physical VMEM per TensorCore (safe lower bound)


def _lane_dense_view_shape(card, dim):
    """Pick a lane-dense (rows, k*128) view for unfriendly dims when possible."""
    if dim % 128 == 0:
        return card, dim
    n = card * dim
    if n % 128 != 0:
        return card, dim  # cannot keep stores fully lane-dense; fall back
    cols = 128
    while cols * 2 <= 2048 and n % (cols * 2) == 0:
        cols *= 2
    return n // cols, cols


def _pipelined_cast_copy(x, weight_matrix):
    orig_shape = weight_matrix.shape
    card, dim = _lane_dense_view_shape(*orig_shape)
    if (card, dim) != orig_shape:
        # Contiguous row-major reshape: a bitcast, no data movement.
        w2 = weight_matrix.reshape(card, dim)
        x2 = x.reshape(card, dim)
    else:
        w2, x2 = weight_matrix, x

    in_item = jnp.dtype(w2.dtype).itemsize
    out_item = jnp.dtype(x2.dtype).itemsize
    # Sublane packing multiple for the narrower dtype (8 for 4B, 16 bf16, 32 int8).
    row_mult = max(8, 32 // min(in_item, out_item))

    vmem_cap = _vmem_capacity_bytes()
    # Double-buffered input + output blocks; keep the working set under ~half
    # of physical VMEM: 2 * rows * cols * (in_item + out_item) <= vmem_cap / 2.
    elems_budget = max(row_mult * 128, (vmem_cap // 2) // (2 * (in_item + out_item)))

    if dim % 128 == 0 and row_mult * dim > elems_budget:
        # Very wide rows: tile the lane axis too (multiples of 128).
        cols = max(128, ((elems_budget // row_mult) // 128) * 128)
        rows = row_mult
    else:
        cols = dim
        rows = max(row_mult, ((elems_budget // max(cols, 1)) // row_mult) * row_mult)
    padded_card = pl.cdiv(card, row_mult) * row_mult
    rows = min(rows, padded_card)

    grid = (pl.cdiv(card, rows), pl.cdiv(dim, cols))
    block = (rows, cols)

    working = 2 * rows * cols * (in_item + out_item)
    vmem_limit = int(min(vmem_cap - (4 << 20), max(16 << 20, working + (2 << 20))))

    out = pl.pallas_call(
        _cast_copy_kernel,
        out_shape=jax.ShapeDtypeStruct((card, dim), x2.dtype),
        grid_spec=pltpu.PrefetchScalarGridSpec(
            num_scalar_prefetch=0,
            grid=grid,
            in_specs=[
                pl.BlockSpec(memory_space=pl.ANY),          # x: alias target only
                pl.BlockSpec(block, lambda i, j: (i, j)),   # weights: pipelined tiles
            ],
            out_specs=pl.BlockSpec(block, lambda i, j: (i, j)),
        ),
        input_output_aliases={0: 0},
        compiler_params=pltpu.CompilerParams(
            dimension_semantics=("parallel", "parallel"),
            vmem_limit_bytes=vmem_limit,
        ),
    )(x2, w2)

    return out.reshape(orig_shape)


# --------------------------------------------------------------------------
# Public wrapper (mirrors PretrainedEmbeddingsInitializer.forward).
# --------------------------------------------------------------------------
def pretrained_embeddings_init(x, weight_matrix, trainable: bool = False):
    """Copies `weight_matrix` into `x` and returns the result.

    Mirrors PretrainedEmbeddingsInitializer.forward: x.copy_(weight_matrix),
    including torch.Tensor.copy_'s cast of the source to the destination dtype.

    For true in-place semantics (the torch copy_ aliasing contract), donate `x`
    at the jit boundary (jax.jit(..., donate_argnums=...)); otherwise XLA will
    allocate a fresh output buffer and may insert a defensive copy of x.
    """
    assert x.ndim == 2 and x.shape == weight_matrix.shape, (
        "x must be a 2D table matching the weight matrix shape")

    # TODO(synk): `trainable` (requires_grad toggle) has no Pallas/JAX runtime
    # equivalent; gradient flow is controlled by the surrounding JAX program.
    del trainable

    if x.dtype == weight_matrix.dtype:
        return _hbm_to_hbm_copy(x, weight_matrix)
    return _pipelined_cast_copy(x, weight_matrix)


if __name__ == "__main__":
    key = jax.random.PRNGKey(0)
    k1, k2, k3, k4, k5, k6, k7, k8 = jax.random.split(key, 8)

    # Case 1: same dtype, lane/sublane-aligned f32 table -> pure HBM->HBM DMA.
    card, dim = 64, 128
    w1 = jax.random.normal(k1, (card, dim), dtype=jnp.float32).at[0].set(0.0)
    x1 = jax.random.normal(k2, (card, dim), dtype=jnp.float32)
    r1 = jax.block_until_ready(pretrained_embeddings_init(x1, w1, trainable=False))
    assert r1.shape == w1.shape and r1.dtype == w1.dtype
    assert bool(jnp.all(r1 == w1)) and bool(jnp.all(r1[0] == 0.0))

    # Case 2: same dtype, odd shape (partial DMA chunks) -> HBM->HBM DMA path.
    w2 = jax.random.normal(k3, (37, 96), dtype=jnp.float32).astype(jnp.bfloat16)
    x2 = jax.random.normal(k4, (37, 96), dtype=jnp.float32).astype(jnp.bfloat16)
    r2 = jax.block_until_ready(pretrained_embeddings_init(x2, w2))
    assert r2.shape == w2.shape and r2.dtype == w2.dtype
    assert bool(jnp.all(r2 == w2))

    # Case 3: dtype cast (f32 -> bf16), dim not lane-dense and not flattenable
    # (37*96 % 128 != 0) -> pipelined cast path with full-extent last dim.
    w3 = jax.random.normal(k5, (37, 96), dtype=jnp.float32).at[0].set(0.0)
    x3 = jax.random.normal(k6, (37, 96), dtype=jnp.float32).astype(jnp.bfloat16)
    r3 = jax.block_until_ready(pretrained_embeddings_init(x3, w3, trainable=True))
    assert r3.shape == w3.shape and r3.dtype == jnp.bfloat16
    assert bool(jnp.all(r3 == w3.astype(jnp.bfloat16)))
    assert bool(jnp.all(r3[0] == 0))

    # Case 4: dtype cast with flattenable shape (24*80 = 15*128) -> lane-dense
    # reshaped cast path.
    w4 = jax.random.normal(k7, (24, 80), dtype=jnp.float32).at[0].set(0.0)
    x4 = jax.random.normal(k8, (24, 80), dtype=jnp.float32).astype(jnp.bfloat16)
    r4 = jax.block_until_ready(pretrained_embeddings_init(x4, w4))
    assert r4.shape == w4.shape and r4.dtype == jnp.bfloat16
    assert bool(jnp.all(r4 == w4.astype(jnp.bfloat16)))
    assert bool(jnp.all(r4[0] == 0))

    print("KERNEL_OK")
</pallas_src>

<mosaic_0001>
module attributes {stable_mosaic.version = 11 : i64} {
  func.func @kernel(%arg0: memref<64x128xf32, #tpu.memory_space<any>>, %arg1: memref<64x128xf32, #tpu.memory_space<any>>, %arg2: memref<64x128xf32, #tpu.memory_space<any>>, %arg3: memref<4x!tpu.dma_semaphore, #tpu.memory_space<semaphore_mem>>) attributes {dimension_semantics = [], scalar_prefetch = 0 : i64, scratch_operands = 1 : i64, tpu.core_type = #tpu.core_type<tc>} {
    %c0_i32 = arith.constant 0 : i32
    %c0_i32_0 = arith.constant 0 : i32
    %c0_i32_1 = arith.constant 0 : i32
    %0 = tpu.memref_slice %arg1[%c0_i32_0, %c0_i32_1] : memref<64x128xf32, #tpu.memory_space<any>> -> memref<16x128xf32, #tpu.memory_space<any>>
    %c0_i32_2 = arith.constant 0 : i32
    %c0_i32_3 = arith.constant 0 : i32
    %1 = tpu.memref_slice %arg2[%c0_i32_2, %c0_i32_3] : memref<64x128xf32, #tpu.memory_space<any>> -> memref<16x128xf32, #tpu.memory_space<any>>
    %2 = tpu.memref_slice %arg3[%c0_i32] : memref<4x!tpu.dma_semaphore, #tpu.memory_space<semaphore_mem>> -> memref<1x!tpu.dma_semaphore, #tpu.memory_space<semaphore_mem>>
    %3 = tpu.memref_squeeze %2 : memref<1x!tpu.dma_semaphore, #tpu.memory_space<semaphore_mem>> -> memref<!tpu.dma_semaphore, #tpu.memory_space<semaphore_mem>>
    tpu.enqueue_dma source(%0 : memref<16x128xf32, #tpu.memory_space<any>>) target(%1 : memref<16x128xf32, #tpu.memory_space<any>>) target_semaphore(%3 : memref<!tpu.dma_semaphore, #tpu.memory_space<semaphore_mem>>)
    %c1_i32 = arith.constant 1 : i32
    %c16_i32 = arith.constant 16 : i32
    %c0_i32_4 = arith.constant 0 : i32
    %4 = tpu.memref_slice %arg1[%c16_i32, %c0_i32_4] : memref<64x128xf32, #tpu.memory_space<any>> -> memref<16x128xf32, #tpu.memory_space<any>>
    %c16_i32_5 = arith.constant 16 : i32
    %c0_i32_6 = arith.constant 0 : i32
    %5 = tpu.memref_slice %arg2[%c16_i32_5, %c0_i32_6] : memref<64x128xf32, #tpu.memory_space<any>> -> memref<16x128xf32, #tpu.memory_space<any>>
    %6 = tpu.memref_slice %arg3[%c1_i32] : memref<4x!tpu.dma_semaphore, #tpu.memory_space<semaphore_mem>> -> memref<1x!tpu.dma_semaphore, #tpu.memory_space<semaphore_mem>>
    %7 = tpu.memref_squeeze %6 : memref<1x!tpu.dma_semaphore, #tpu.memory_space<semaphore_mem>> -> memref<!tpu.dma_semaphore, #tpu.memory_space<semaphore_mem>>
    tpu.enqueue_dma source(%4 : memref<16x128xf32, #tpu.memory_space<any>>) target(%5 : memref<16x128xf32, #tpu.memory_space<any>>) target_semaphore(%7 : memref<!tpu.dma_semaphore, #tpu.memory_space<semaphore_mem>>)
    %c2_i32 = arith.constant 2 : i32
    %c32_i32 = arith.constant 32 : i32
    %c0_i32_7 = arith.constant 0 : i32
    %8 = tpu.memref_slice %arg1[%c32_i32, %c0_i32_7] : memref<64x128xf32, #tpu.memory_space<any>> -> memref<16x128xf32, #tpu.memory_space<any>>
    %c32_i32_8 = arith.constant 32 : i32
    %c0_i32_9 = arith.constant 0 : i32
    %9 = tpu.memref_slice %arg2[%c32_i32_8, %c0_i32_9] : memref<64x128xf32, #tpu.memory_space<any>> -> memref<16x128xf32, #tpu.memory_space<any>>
    %10 = tpu.memref_slice %arg3[%c2_i32] : memref<4x!tpu.dma_semaphore, #tpu.memory_space<semaphore_mem>> -> memref<1x!tpu.dma_semaphore, #tpu.memory_space<semaphore_mem>>
    %11 = tpu.memref_squeeze %10 : memref<1x!tpu.dma_semaphore, #tpu.memory_space<semaphore_mem>> -> memref<!tpu.dma_semaphore, #tpu.memory_space<semaphore_mem>>
    tpu.enqueue_dma source(%8 : memref<16x128xf32, #tpu.memory_space<any>>) target(%9 : memref<16x128xf32, #tpu.memory_space<any>>) target_semaphore(%11 : memref<!tpu.dma_semaphore, #tpu.memory_space<semaphore_mem>>)
    %c3_i32 = arith.constant 3 : i32
    %c48_i32 = arith.constant 48 : i32
    %c0_i32_10 = arith.constant 0 : i32
    %12 = tpu.memref_slice %arg1[%c48_i32, %c0_i32_10] : memref<64x128xf32, #tpu.memory_space<any>> -> memref<16x128xf32, #tpu.memory_space<any>>
    %c48_i32_11 = arith.constant 48 : i32
    %c0_i32_12 = arith.constant 0 : i32
    %13 = tpu.memref_slice %arg2[%c48_i32_11, %c0_i32_12] : memref<64x128xf32, #tpu.memory_space<any>> -> memref<16x128xf32, #tpu.memory_space<any>>
    %14 = tpu.memref_slice %arg3[%c3_i32] : memref<4x!tpu.dma_semaphore, #tpu.memory_space<semaphore_mem>> -> memref<1x!tpu.dma_semaphore, #tpu.memory_space<semaphore_mem>>
    %15 = tpu.memref_squeeze %14 : memref<1x!tpu.dma_semaphore, #tpu.memory_space<semaphore_mem>> -> memref<!tpu.dma_semaphore, #tpu.memory_space<semaphore_mem>>
    tpu.enqueue_dma source(%12 : memref<16x128xf32, #tpu.memory_space<any>>) target(%13 : memref<16x128xf32, #tpu.memory_space<any>>) target_semaphore(%15 : memref<!tpu.dma_semaphore, #tpu.memory_space<semaphore_mem>>)
    %c0_i32_13 = arith.constant 0 : i32
    %c0_i32_14 = arith.constant 0 : i32
    %c0_i32_15 = arith.constant 0 : i32
    %16 = tpu.memref_slice %arg1[%c0_i32_14, %c0_i32_15] : memref<64x128xf32, #tpu.memory_space<any>> -> memref<16x128xf32, #tpu.memory_space<any>>
    %c0_i32_16 = arith.constant 0 : i32
    %c0_i32_17 = arith.constant 0 : i32
    %17 = tpu.memref_slice %arg2[%c0_i32_16, %c0_i32_17] : memref<64x128xf32, #tpu.memory_space<any>> -> memref<16x128xf32, #tpu.memory_space<any>>
    %18 = tpu.memref_slice %arg3[%c0_i32_13] : memref<4x!tpu.dma_semaphore, #tpu.memory_space<semaphore_mem>> -> memref<1x!tpu.dma_semaphore, #tpu.memory_space<semaphore_mem>>
    %19 = tpu.memref_squeeze %18 : memref<1x!tpu.dma_semaphore, #tpu.memory_space<semaphore_mem>> -> memref<!tpu.dma_semaphore, #tpu.memory_space<semaphore_mem>>
    tpu.wait_dma2 semaphore(%19 : memref<!tpu.dma_semaphore, #tpu.memory_space<semaphore_mem>>) src(%16 : memref<16x128xf32, #tpu.memory_space<any>>) dst(%17 : memref<16x128xf32, #tpu.memory_space<any>>)
    %c1_i32_18 = arith.constant 1 : i32
    %c16_i32_19 = arith.constant 16 : i32
    %c0_i32_20 = arith.constant 0 : i32
    %20 = tpu.memref_slice %arg1[%c16_i32_19, %c0_i32_20] : memref<64x128xf32, #tpu.memory_space<any>> -> memref<16x128xf32, #tpu.memory_space<any>>
    %c16_i32_21 = arith.constant 16 : i32
    %c0_i32_22 = arith.constant 0 : i32
    %21 = tpu.memref_slice %arg2[%c16_i32_21, %c0_i32_22] : memref<64x128xf32, #tpu.memory_space<any>> -> memref<16x128xf32, #tpu.memory_space<any>>
    %22 = tpu.memref_slice %arg3[%c1_i32_18] : memref<4x!tpu.dma_semaphore, #tpu.memory_space<semaphore_mem>> -> memref<1x!tpu.dma_semaphore, #tpu.memory_space<semaphore_mem>>
    %23 = tpu.memref_squeeze %22 : memref<1x!tpu.dma_semaphore, #tpu.memory_space<semaphore_mem>> -> memref<!tpu.dma_semaphore, #tpu.memory_space<semaphore_mem>>
    tpu.wait_dma2 semaphore(%23 : memref<!tpu.dma_semaphore, #tpu.memory_space<semaphore_mem>>) src(%20 : memref<16x128xf32, #tpu.memory_space<any>>) dst(%21 : memref<16x128xf32, #tpu.memory_space<any>>)
    %c2_i32_23 = arith.constant 2 : i32
    %c32_i32_24 = arith.constant 32 : i32
    %c0_i32_25 = arith.constant 0 : i32
    %24 = tpu.memref_slice %arg1[%c32_i32_24, %c0_i32_25] : memref<64x128xf32, #tpu.memory_space<any>> -> memref<16x128xf32, #tpu.memory_space<any>>
    %c32_i32_26 = arith.constant 32 : i32
    %c0_i32_27 = arith.constant 0 : i32
    %25 = tpu.memref_slice %arg2[%c32_i32_26, %c0_i32_27] : memref<64x128xf32, #tpu.memory_space<any>> -> memref<16x128xf32, #tpu.memory_space<any>>
    %26 = tpu.memref_slice %arg3[%c2_i32_23] : memref<4x!tpu.dma_semaphore, #tpu.memory_space<semaphore_mem>> -> memref<1x!tpu.dma_semaphore, #tpu.memory_space<semaphore_mem>>
    %27 = tpu.memref_squeeze %26 : memref<1x!tpu.dma_semaphore, #tpu.memory_space<semaphore_mem>> -> memref<!tpu.dma_semaphore, #tpu.memory_space<semaphore_mem>>
    tpu.wait_dma2 semaphore(%27 : memref<!tpu.dma_semaphore, #tpu.memory_space<semaphore_mem>>) src(%24 : memref<16x128xf32, #tpu.memory_space<any>>) dst(%25 : memref<16x128xf32, #tpu.memory_space<any>>)
    %c3_i32_28 = arith.constant 3 : i32
    %c48_i32_29 = arith.constant 48 : i32
    %c0_i32_30 = arith.constant 0 : i32
    %28 = tpu.memref_slice %arg1[%c48_i32_29, %c0_i32_30] : memref<64x128xf32, #tpu.memory_space<any>> -> memref<16x128xf32, #tpu.memory_space<any>>
    %c48_i32_31 = arith.constant 48 : i32
    %c0_i32_32 = arith.constant 0 : i32
    %29 = tpu.memref_slice %arg2[%c48_i32_31, %c0_i32_32] : memref<64x128xf32, #tpu.memory_space<any>> -> memref<16x128xf32, #tpu.memory_space<any>>
    %30 = tpu.memref_slice %arg3[%c3_i32_28] : memref<4x!tpu.dma_semaphore, #tpu.memory_space<semaphore_mem>> -> memref<1x!tpu.dma_semaphore, #tpu.memory_space<semaphore_mem>>
    %31 = tpu.memref_squeeze %30 : memref<1x!tpu.dma_semaphore, #tpu.memory_space<semaphore_mem>> -> memref<!tpu.dma_semaphore, #tpu.memory_space<semaphore_mem>>
    tpu.wait_dma2 semaphore(%31 : memref<!tpu.dma_semaphore, #tpu.memory_space<semaphore_mem>>) src(%28 : memref<16x128xf32, #tpu.memory_space<any>>) dst(%29 : memref<16x128xf32, #tpu.memory_space<any>>)
    return
  }
}

</mosaic_0001>

<bundles_post_ra>
// kernel: tpu_custom_call.1
= control target key start
LH: loop header
LB: loop body
LE: loop exit
PB: predicated region body
PF: predicated region fallthrough
CT: control target
= control target key end

     0   :  { %s325_s0 = inlined_call_operand.hbm [shape: f32[64,128], index: 0, kind: input, shape index: {}, may-alias: {0,2}]   ;;  %s326_s1 = inlined_call_operand.vmem [shape: f32[64,128], index: 1, kind: input, shape index: {}]   ;;  %s327_s2 = inlined_call_operand.hbm [shape: f32[64,128], index: 2, kind: output, shape index: {}, may-alias: {0,2}]  }
   0x1   :  { %s14_s11 = sshll.u32 %s326_s1, 4  ;;  %s18_s14 = scalar_lea.vmem %s326_s1, 16  ;;  %s226_s11 = int_to_ptr.vmem [resolvable:$true] %s14_s11 }
   0x2   :  { %s231_s0 = scalar_lea.hbm %s327_s2, 256  ;;  %s100_s17 = scalar_lea.vmem %s226_s11, 256 }
   0x3   :  { %p101_p0 = scmp.ne.s32.totalorder %s226_s11, %s100_s17  ;;  %s236_s18 = scalar_lea.vmem %s226_s11, 1024 }
   0x4   :  { %p105_p1 = scmp.lt.s32.totalorder %s226_s11, %s226_s11  ;;  %p106_p2 = scmp.lt.s32.totalorder %s236_s18, %s100_s17 }
   0x6   :  { %p107_p3 = por %p106_p2, %p105_p1 }
   0x8   :  { %p108_p4 = pnand %p107_p3, %p101_p0 }
   0xa   :  { %111 = shalt.err (!%p108_p4)  }
   0xb   :  { %p113_p5 = scmp.ne.s32.totalorder %s327_s2, %s231_s0  ;;  %s248_s23 = scalar_lea.hbm %s327_s2, 1024 }
   0xc   :  { %p115_p6 = scmp.lt.u32.totalorder %s248_s23, %s231_s0  ;;  %p116_p7 = scmp.lt.u32.totalorder %s231_s0, %s327_s2 }
   0xe   :  { %p117_p8 = por %p116_p7, %p115_p6 }
  0x10   :  { %p118_p9 = pnand %p117_p8, %p113_p5 }
  0x12   :  { %121 = shalt.err (!%p118_p9)  }
  0x13   :  { %17 = dma.vmem_to_hbm [thread:$0]  %s226_s11, 256, %s327_s2, [#allocation2] }
  0x14   :  { %s28_s30 = sshll.u32 %s18_s14, 4  ;;  %s32_s5 = scalar_lea.vmem %s326_s1, 32  ;;  %s29_s30 = int_to_ptr.vmem [resolvable:$true] %s28_s30 }
  0x15   :  { %s271_s8 = scalar_lea.hbm %s327_s2, 512  ;;  %s122_s9 = scalar_lea.vmem %s29_s30, 256 }
  0x16   :  { %p123_p10 = scmp.ne.s32.totalorder %s29_s30, %s122_s9  ;;  %p127_p11 = scmp.lt.s32.totalorder %s29_s30, %s226_s11 }
  0x17   :  { %p128_p12 = scmp.lt.s32.totalorder %s236_s18, %s122_s9 }
  0x19   :  { %p129_p13 = por %p128_p12, %p127_p11 }
  0x1b   :  { %p130_p0 = pnand %p129_p13, %p123_p10 }
  0x1d   :  { %133 = shalt.err (!%p130_p0)  }
  0x1e   :  { %p135_p1 = scmp.ne.s32.totalorder %s231_s0, %s271_s8  ;;  %p138_p2 = scmp.lt.u32.totalorder %s248_s23, %s271_s8 }
  0x1f   :  { %p140_p4 = scmp.lt.u32.totalorder %s271_s8, %s231_s0 }
  0x20   :  { %p139_p3 = por %p138_p2, %p116_p7 }
  0x22   :  { %p141_p5 = por %p140_p4, %p139_p3 }
  0x24   :  { %p142_p6 = pnand %p141_p5, %p135_p1 }
  0x26   :  { %145 = shalt.err (!%p142_p6)  }
  0x27   :  { %31 = dma.vmem_to_hbm [thread:$0]  %s29_s30, 256, %s231_s0, [#allocation2 + $0x1] }
  0x28   :  { %s42_s13 = sshll.u32 %s32_s5, 4  ;;  %s46_s16 = scalar_lea.vmem %s326_s1, 48  ;;  %s43_s13 = int_to_ptr.vmem [resolvable:$true] %s42_s13 }
  0x29   :  { %s293_s20 = scalar_lea.hbm %s327_s2, 768  ;;  %s147_s21 = scalar_lea.vmem %s43_s13, 256 }
  0x2a   :  { %p148_p7 = scmp.ne.s32.totalorder %s43_s13, %s147_s21  ;;  %p152_p8 = scmp.lt.s32.totalorder %s43_s13, %s226_s11 }
  0x2b   :  { %p153_p9 = scmp.lt.s32.totalorder %s236_s18, %s147_s21 }
  0x2d   :  { %p154_p10 = por %p153_p9, %p152_p8 }
  0x2f   :  { %p155_p11 = pnand %p154_p10, %p148_p7 }
  0x31   :  { %158 = shalt.err (!%p155_p11)  }
  0x32   :  { %p160_p12 = scmp.ne.s32.totalorder %s271_s8, %s293_s20  ;;  %p162_p13 = scmp.lt.u32.totalorder %s271_s8, %s327_s2 }
  0x33   :  { %p163_p0 = scmp.lt.u32.totalorder %s248_s23, %s293_s20  ;;  %p165_p2 = scmp.lt.u32.totalorder %s293_s20, %s271_s8 }
  0x35   :  { %p164_p1 = por %p163_p0, %p162_p13 }
  0x37   :  { %p166_p3 = por %p165_p2, %p164_p1 }
  0x39   :  { %p167_p4 = pnand %p166_p3, %p160_p12 }
  0x3b   :  { %170 = shalt.err (!%p167_p4)  }
  0x3c   :  { %45 = dma.vmem_to_hbm [thread:$0]  %s43_s13, 256, %s271_s8, [#allocation2 + $0x2] }
  0x3d   :  { %s56_s22 = sshll.u32 %s46_s16, 4  ;;  %s57_s22 = int_to_ptr.vmem [resolvable:$true] %s56_s22 }
  0x3e   :  { %s172_s24 = scalar_lea.vmem %s57_s22, 256  ;;  %p177_p6 = scmp.lt.s32.totalorder %s57_s22, %s226_s11 }
  0x3f   :  { %p173_p5 = scmp.ne.s32.totalorder %s57_s22, %s172_s24  ;;  %p178_p7 = scmp.lt.s32.totalorder %s236_s18, %s172_s24 }
  0x41   :  { %p179_p8 = por %p178_p7, %p177_p6 }
  0x43   :  { %p180_p9 = pnand %p179_p8, %p173_p5 }
  0x45   :  { %183 = shalt.err (!%p180_p9)  }
  0x46   :  { %p185_p10 = scmp.ne.s32.totalorder %s293_s20, %s248_s23  ;;  %p187_p11 = scmp.lt.u32.totalorder %s293_s20, %s327_s2 }
  0x47   :  { %p188_p12 = scmp.lt.u32.totalorder %s248_s23, %s248_s23 }
  0x49   :  { %p189_p13 = por %p188_p12, %p187_p11 }
  0x4b   :  { %p191_p1 = por %p189_p13, %p163_p0 }
  0x4d   :  { %p192_p2 = pnand %p191_p1, %p185_p10 }
  0x4f   :  { %195 = shalt.err (!%p192_p2)  }
  0x50   :  { %59 = dma.vmem_to_hbm [thread:$0]  %s57_s22, 256, %s293_s20, [#allocation2 + $0x3] }
  0x51   :  { %197 = dma.done.wait [#allocation2], 256 }
  0x52   :  { %198 = vsyncadd [#allocation2], 4294967040 }
  0x53   :  { %199 = dma.done.wait [#allocation2 + $0x1], 256 }
  0x54   :  { %200 = vsyncadd [#allocation2 + $0x1], 4294967040 }
  0x55   :  { %201 = dma.done.wait [#allocation2 + $0x2], 256 }
  0x56   :  { %202 = vsyncadd [#allocation2 + $0x2], 4294967040 }
  0x57   :  { %203 = dma.done.wait [#allocation2 + $0x3], 256 }
  0x58   :  { %204 = vsyncadd [#allocation2 + $0x3], 4294967040 }
  0x59   :  { %69 = vsyncmov [#allocation2] }
  0x5c   :  { %s70_s11 = vpop.sfrf %69 }
  0x5d   :  { %p96_p3 = scmp.ne.s32.totalorder %s70_s11, 0 }
  0x5f   :  { %74 = shalt.err (%p96_p3)  }
  0x60   :  { %76 = vsyncmov [#allocation2 + $0x1] }
  0x63   :  { %s77_s2 = vpop.sfrf %76 }
  0x64   :  { %p97_p4 = scmp.ne.s32.totalorder %s77_s2, 0 }
  0x66   :  { %81 = shalt.err (%p97_p4)  }
  0x67   :  { %83 = vsyncmov [#allocation2 + $0x2] }
  0x6a   :  { %s84_s18 = vpop.sfrf %83 }
  0x6b   :  { %p98_p0 = scmp.ne.s32.totalorder %s84_s18, 0 }
  0x6d   :  { %88 = shalt.err (%p98_p0)  }
  0x6e   :  { %90 = vsyncmov [#allocation2 + $0x3] }
  0x71   :  { %s91_s23 = vpop.sfrf %90 }
  0x72   :  { %p99_p5 = scmp.ne.s32.totalorder %s91_s23, 0 }
  0x74   :  { %95 = shalt.err (%p99_p5)  }

</bundles_post_ra>
